<compile_context>
chip_gen: v7x
topology: tpu7x:2x2x1
jax: 0.10.0
libtpu: 0.0.40
codegen_flags: <defaults>
</compile_context>

<pallas_src>
import jax
import jax.numpy as jnp
from jax.experimental import pallas as pl
from jax.experimental.pallas import tpu as pltpu

_LANE = 128


def _make_kernel(tile_spatial: int, hw: int, use_weight: bool, needs_mask: bool):
    """Build the per-(sample, spatial-tile) fuzzy-loss kernel body."""

    def kernel(*refs):
        if use_weight:
            w_ref, x_ref, o_ref = refs      # w_ref: (1, C, 1) f32 in VMEM
        else:
            x_ref, o_ref = refs

        j = pl.program_id(1)                # spatial-tile index (reduction axis)

        @pl.when(j == 0)
        def _init():
            o_ref[...] = jnp.zeros_like(o_ref)

        x = x_ref[...].astype(jnp.float32)             # (1, C, TS)

        # Channel-softmax pieces: single reciprocal per pixel instead of C divides.
        m = jnp.max(x, axis=1, keepdims=True)          # (1, 1, TS)
        e = jnp.exp(x - m)                             # (1, C, TS)
        s = jnp.sum(e, axis=1, keepdims=True)          # (1, 1, TS)
        r = 1.0 / s                                    # exact (feeds a log below)

        if use_weight:
            # pixel = -log(1 - prod_c (1 - p_c)^w_c)
            #       = -log(1 - exp(sum_c w_c * log(1 - p_c)))
            # with 1 - p_c computed as (s - e_c) * r  (>= 0 in fp).
            w = w_ref[...]                             # (1, C, 1), lane-broadcasts
            log1mp = jnp.log((s - e) * r)              # (1, C, TS)
            wsum = jnp.sum(w * log1mp, axis=1, keepdims=True)   # (1, 1, TS)
            wsum = jnp.minimum(wsum, 0.0)              # guard fp drift above 1
            pixel = -jnp.log(1.0 - jnp.exp(wsum))      # (1, 1, TS)
        else:
            # pixel = p0 * p1 = e0 * e1 * r^2  (softmax never materialized)
            pixel = (e[:, 0:1, :] * e[:, 1:2, :]) * (r * r)     # (1, 1, TS)

        if needs_mask:
            lane = jax.lax.broadcasted_iota(jnp.int32, pixel.shape, 2)
            pixel = jnp.where(j * tile_spatial + lane < hw, pixel, 0.0)

        # Partial spatial sum for this tile, accumulated into the resident
        # per-sample output block (scalar broadcast over the (1, 8, 128) block;
        # the wrapper reads element [0, 0] and divides by H*W once).
        o_ref[...] += jnp.sum(pixel)

    return kernel


def fuzzy_classification_loss(x, weight=None, reduction="mean", spatial_tile=None):
    """Pallas implementation of FuzzyClassificationLoss.forward.

    x: (N, C, H, W) logits. weight: optional (C,) non-negative per-channel weights.
    Returns a scalar for reduction in {'mean', 'sum'}, else a (N,) vector.
    """
    N, C, H, W = x.shape
    HW = H * W

    hw_ceil = -(-HW // _LANE) * _LANE
    if spatial_tile is None:
        # ~512 KiB of f32 input per grid step; lane-aligned.
        target = max(_LANE, ((512 * 1024) // (C * 4)) // _LANE * _LANE)
    else:
        target = max(_LANE, -(-int(spatial_tile) // _LANE) * _LANE)
    ts = min(hw_ceil, target)
    num_tiles = -(-HW // ts)
    hw_pad = num_tiles * ts

    xr = x.reshape(N, C, HW)                # zero-copy for contiguous NCHW
    if hw_pad != HW:
        xr = jnp.pad(xr, ((0, 0), (0, 0), (0, hw_pad - HW)))

    use_weight = weight is not None
    kernel = _make_kernel(ts, HW, use_weight, needs_mask=(hw_pad != HW))

    in_specs = []
    args = []
    if use_weight:
        w3 = jnp.asarray(weight, jnp.float32).reshape(1, C, 1)
        in_specs.append(pl.BlockSpec((1, C, 1), lambda i, j: (0, 0, 0)))
        args.append(w3)
    in_specs.append(pl.BlockSpec((1, C, ts), lambda i, j: (i, 0, j)))
    args.append(xr)

    out = pl.pallas_call(
        kernel,
        out_shape=jax.ShapeDtypeStruct((N, 8, _LANE), jnp.float32),
        grid_spec=pltpu.PrefetchScalarGridSpec(
            num_scalar_prefetch=0,
            grid=(N, num_tiles),
            in_specs=in_specs,
            out_specs=pl.BlockSpec((1, 8, _LANE), lambda i, j: (i, 0, 0)),
        ),
        compiler_params=pltpu.CompilerParams(
            # Batch axis shards across TensorCores (v7x megacore); spatial axis
            # is the reduction into the resident per-sample output block.
            # Blocks are small enough that default scoped VMEM suffices on all
            # of v5e / v6e / v7x, so vmem_limit_bytes is left at its default.
            dimension_semantics=("parallel", "arbitrary")),
    )(*args)

    per_sample = out[:, 0, 0] / float(HW)   # (N,) per-sample spatial means

    if reduction == "mean":
        # Equal H*W per sample, so mean-of-per-sample-means == global pixel mean.
        return jnp.mean(per_sample)
    elif reduction == "sum":
        return jnp.sum(per_sample)
    return per_sample


def _reference_loss(x, weight=None, reduction="mean"):
    """Pure-JAX reference mirroring the PyTorch forward exactly."""
    p = jax.nn.softmax(x.astype(jnp.float32), axis=1)
    if weight is None:
        pixel = p[:, 0, :, :] * p[:, 1, :, :]
    else:
        w = jnp.asarray(weight, jnp.float32).reshape(1, -1, 1, 1)
        pixel = -jnp.log(1.0 - jnp.prod(jnp.power(1.0 - p, w), axis=1))
    if reduction == "mean":
        return pixel.mean()
    elif reduction == "sum":
        return pixel.mean(axis=(1, 2)).sum()
    else:
        return pixel.mean(axis=(1, 2))


if __name__ == "__main__":
    key = jax.random.PRNGKey(0)
    k1, k2 = jax.random.split(key)

    # Case A: H*W already a multiple of 128 (single spatial tile).
    x1 = jax.random.normal(k1, (2, 4, 16, 16), dtype=jnp.float32)
    w4 = jnp.array([0.5, 1.0, 2.0, 1.5], dtype=jnp.float32)

    # Case B: H*W = 100 < 128 -> exercises lane padding + mask.
    x2 = jax.random.normal(k2, (2, 3, 10, 10), dtype=jnp.float32)
    w3 = jnp.array([1.0, 0.7, 1.3], dtype=jnp.float32)

    cases = [
        (x1, None, "mean", None),
        (x1, None, "none", None),
        (x1, w4, "mean", None),
        (x1, w4, "sum", None),
        (x1, w4, "none", None),
        # Force 2 spatial tiles to exercise the accumulation path.
        (x1, None, "mean", 128),
        (x1, w4, "none", 128),
        # Padded / masked spatial axis.
        (x2, None, "mean", None),
        (x2, w3, "none", None),
    ]

    for xi, w, red, st in cases:
        out = fuzzy_classification_loss(xi, weight=w, reduction=red, spatial_tile=st)
        out = jax.block_until_ready(out)
        ref = _reference_loss(xi, weight=w, reduction=red)
        assert jnp.allclose(out, ref, rtol=1e-4, atol=1e-5), (
            xi.shape, w is not None, red, st, out, ref)

    print("KERNEL_OK")
</pallas_src>

<mosaic_0001>
module attributes {stable_mosaic.version = 11 : i64} {
  func.func @kernel(%arg0: i32, %arg1: i32, %arg2: memref<1x4x256xf32, #tpu.memory_space<vmem>>, %arg3: memref<1x8x128xf32, #tpu.memory_space<vmem>>) attributes {dimension_semantics = [#tpu.dimension_semantics<parallel>, #tpu.dimension_semantics<arbitrary>], iteration_bounds = array<i64: 2, 1>, scalar_prefetch = 0 : i64, scratch_operands = 0 : i64, tpu.core_type = #tpu.core_type<tc>, window_params = [{transform_indices = @transform_0, window_bounds = array<i64: 1, 4, 256>}, {transform_indices = @transform_1, window_bounds = array<i64: 1, 8, 128>}]} {
    %c0_i32 = arith.constant 0 : i32
    %0 = arith.cmpi eq, %arg1, %c0_i32 : i32
    %1 = arith.extui %0 : i1 to i32
    %c0_i32_0 = arith.constant 0 : i32
    %2 = arith.cmpi ne, %1, %c0_i32_0 : i32
    scf.if %2 {
      %cst_12 = arith.constant 0.000000e+00 : f32
      %26 = vector.broadcast %cst_12 : f32 to vector<1x8x128xf32>
      %c0_13 = arith.constant 0 : index
      %c0_14 = arith.constant 0 : index
      %c0_15 = arith.constant 0 : index
      %27 = vector.load %arg3[%c0_13, %c0_14, %c0_15] : memref<1x8x128xf32, #tpu.memory_space<vmem>>, vector<1x8x128xf32>
      tpu.vector_store %arg3[%c0_13, %c0_14, %c0_15], %26 {strides = array<i32>} : memref<1x8x128xf32, #tpu.memory_space<vmem>>, vector<1x8x128xf32>,
    } else {
    }
    %c0 = arith.constant 0 : index
    %c0_1 = arith.constant 0 : index
    %c0_2 = arith.constant 0 : index
    %3 = vector.load %arg2[%c0, %c0_1, %c0_2] : memref<1x4x256xf32, #tpu.memory_space<vmem>>, vector<1x4x256xf32>
    %cst = arith.constant dense<0xFF800000> : vector<1x256xf32>
    %4 = vector.multi_reduction <maximumf>, %3, %cst [1] : vector<1x4x256xf32> to vector<1x256xf32>
    %5 = vector.shape_cast %4 : vector<1x256xf32> to vector<1x1x256xf32>
    %6 = vector.broadcast %5 : vector<1x1x256xf32> to vector<1x4x256xf32>
    %7 = arith.subf %3, %6 : vector<1x4x256xf32>
    %8 = math.exp %7 : vector<1x4x256xf32>
    %cst_3 = arith.constant dense<0.000000e+00> : vector<1x256xf32>
    %9 = vector.multi_reduction <add>, %8, %cst_3 [1] : vector<1x4x256xf32> to vector<1x256xf32>
    %10 = vector.shape_cast %9 : vector<1x256xf32> to vector<1x1x256xf32>
    %cst_4 = arith.constant 1.000000e+00 : f32
    %11 = vector.broadcast %cst_4 : f32 to vector<1x1x256xf32>
    %12 = arith.divf %11, %10 : vector<1x1x256xf32>
    %13 = vector.extract_strided_slice %8 {offsets = [0, 0, 0], sizes = [1, 1, 256], strides = [1, 1, 1]} : vector<1x4x256xf32> to vector<1x1x256xf32>
    %14 = vector.extract_strided_slice %8 {offsets = [0, 1, 0], sizes = [1, 1, 256], strides = [1, 1, 1]} : vector<1x4x256xf32> to vector<1x1x256xf32>
    %15 = arith.mulf %13, %14 : vector<1x1x256xf32>
    %16 = arith.mulf %12, %12 : vector<1x1x256xf32>
    %17 = arith.mulf %15, %16 : vector<1x1x256xf32>
    %c0_5 = arith.constant 0 : index
    %c0_6 = arith.constant 0 : index
    %c0_7 = arith.constant 0 : index
    %18 = vector.load %arg3[%c0_5, %c0_6, %c0_7] : memref<1x8x128xf32, #tpu.memory_space<vmem>>, vector<1x8x128xf32>
    %19 = vector.shape_cast %17 : vector<1x1x256xf32> to vector<1x1x1x256xf32>
    %cst_8 = arith.constant dense<0.000000e+00> : vector<1xf32>
    %20 = vector.multi_reduction <add>, %19, %cst_8 [1, 2, 3] : vector<1x1x1x256xf32> to vector<1xf32>
    %21 = vector.shape_cast %20 : vector<1xf32> to vector<1x1x1x1xf32>
    %22 = vector.extract %21[0, 0, 0, 0] : f32 from vector<1x1x1x1xf32>
    %23 = vector.broadcast %22 : f32 to vector<1x8x128xf32>
    %24 = arith.addf %18, %23 : vector<1x8x128xf32>
    %c0_9 = arith.constant 0 : index
    %c0_10 = arith.constant 0 : index
    %c0_11 = arith.constant 0 : index
    %25 = vector.load %arg3[%c0_9, %c0_10, %c0_11] : memref<1x8x128xf32, #tpu.memory_space<vmem>>, vector<1x8x128xf32>
    tpu.vector_store %arg3[%c0_9, %c0_10, %c0_11], %24 {strides = array<i32>} : memref<1x8x128xf32, #tpu.memory_space<vmem>>, vector<1x8x128xf32>,
    return
  }
  func.func @transform_0(%arg0: i32, %arg1: i32) -> (i32, i32, i32) {
    %c0_i32 = arith.constant 0 : i32
    %c0_i32_0 = arith.constant 0 : i32
    return %arg0, %c0_i32, %arg1 : i32, i32, i32
  }
  func.func @transform_1(%arg0: i32, %arg1: i32) -> (i32, i32, i32) {
    %c0_i32 = arith.constant 0 : i32
    %c0_i32_0 = arith.constant 0 : i32
    %c0_i32_1 = arith.constant 0 : i32
    return %arg0, %c0_i32, %c0_i32_0 : i32, i32, i32
  }
}

</mosaic_0001>

<bundles_post_ra>
// kernel: tpu_custom_call.1
= control target key start
LH: loop header
LB: loop body
LE: loop exit
PB: predicated region body
PF: predicated region fallthrough
CT: control target
= control target key end

     0   :  { %6 = vsyncpa [#allocation3], 0  ;;  %s730_s0 = inlined_call_operand.hbm [shape: f32[2,4,256], index: 0, kind: input, shape index: {}]   ;;  %s731_s1 = inlined_call_operand.hbm [shape: f32[2,8,128], index: 1, kind: output, shape index: {}]  }
   0x1   :  { %8 = vsyncpa [#allocation3 + $0x1], 0 }
   0x2   :  { %9 = vsyncpa [#allocation4], 0 }
   0x3   :  { %11 = vsyncpa [#allocation4 + $0x1], 0  ;;  %s550_s6 = smov 0   ;;  %s552_s7 = smov 0  }
   0x4   :  { %s554_s8 = smov 0   ;;  %s556_s9 = smov 0  }
   0x5   :  { %s558_s10 = smov 0   ;;  %s560_s11 = smov 0  }
   0x6 LB: > { %s336_s12 = sadd.s32 4294967295, %s536_s11   ;;  %s337_s13 = sadd.s32 4294967294, %s536_s11   ;;  %s536_s11 = sphi %s560_s11, %s17_s11   ;;  %s532_s10 = sphi %s558_s10, %s747_s10   ;;  %s528_s9 = sphi %s556_s9, %s746_s9   ;;  %s524_s8 = sphi %s554_s8, %s745_s8   ;;  %s520_s7 = sphi %s552_s7, %s744_s7   ;;  %s516_s6 = sphi %s550_s6, %s743_s6  }
   0x7   : > { %s29_s14 = sadd.s32 1, %s532_s10  ;;  %s38_s15 = sadd.s32 1, %s524_s8 }
   0x8   : > { %p31_p0 = scmp.ge.s32.totalorder %s29_s14, 2  ;;  %p45_p1 = scmp.ne.s32.totalorder %s524_s8, %s520_s7 }
   0x9   : > { %p46_p2 = scmp.eq.s32.totalorder %s536_s11, 0  ;;  %p51_p3 = scmp.ne.s32.totalorder %s520_s7, %s516_s6 }
   0xa   : > { %s749_s14 = smov (%p31_p0, %s29_s14), 0  ;;  %p52_p5 = scmp.eq.s32.totalorder %s336_s12, 0 }
   0xb   : > { %p591_p4 = por %p46_p2, %p45_p1  ;;  %s33_s17 = ssub.s32 %s532_s10, %s749_s14 }
   0xc   : > { %p75_p6 = scmp.eq.s32.totalorder %s336_s12, 1  ;;  %p36_p7 = scmp.eq.s32.totalorder %s33_s17, 0 }
   0xd   : > { %p597_p8 = por %p52_p5, %p51_p3  ;;  %p81_p10 = scmp.eq.s32.totalorder %s337_s13, 1 }
   0xe   : > { %p601_p9 = por %p75_p6, %p45_p1  ;;  %p366_p13 = scmp.lt.s32.totalorder %s536_s11, 2 }
   0xf   : > { %s606_s20 = scalar_select %p36_p7, %s524_s8, %s38_s15  }
  0x10   : > { %s735_s19 = scalar_select %p601_p9, 1, 0 }
  0x11   : > { %p608_p11 = por %p81_p10, %p51_p3  ;;  %s101_s22 = sand.u32 1, %s524_s8  }
  0x12   : > { %s340_s23 = sshll.u32 %s101_s22, 3  ;;  %s351_s24 = sshll.u32 %s532_s10, 7 }
  0x13   : > { %s736_s21 = scalar_select %p608_p11, 1, 0 }
  0x14   : > { %s619_s27 = scalar_lea.hbm %s730_s0, %s351_s24  ;;  %s105_s28 = scalar_lea.vmem [#allocation2], %s340_s23 }
  0x15   : > { %s115_s29 = sshll.u32 %s105_s28, 4  ;;  %p625_p0 = pnand %p366_p13, %p591_p4  ;;  %s621_s29 = int_to_ptr.vmem [resolvable:$true] %s115_s29 }
  0x16   : > { %s102_s2 = scalar_lea.sflag [#allocation3], %s101_s22  ;;  %s424_s3 = scalar_lea.hbm %s619_s27, 128 }
  0x17   : > { %p425_p3 = scmp.ne.s32.totalorder %s619_s27, %s424_s3  ;;  %p426_p5 = pneg %p625_p0 }
  0x18   : > { %s429_s12 = scalar_lea.hbm %s730_s0, 256  ;;  %p430_p4 = scmp.lt.u32.totalorder %s619_s27, %s730_s0 }
  0x19   : > { %p427_p6 = pnand %p426_p5, %p425_p3  ;;  %p431_p10 = scmp.lt.u32.totalorder %s429_s12, %s424_s3 }
  0x1a   : > { %p433_p12 = scmp.lt.u32.totalorder %s424_s3, %s619_s27 }
  0x1b   : > { %p428_p7 = pneg %p427_p6  ;;  %p432_p13 = por %p431_p10, %p430_p4 }
  0x1d   : > { %p434_p1 = por %p433_p12, %p432_p13 }
  0x1f   : > { %p435_p2 = pnand %p434_p1, %p428_p7 }
  0x21   : > { %438 = shalt.err (!%p435_p2)
}
  0x22   : > { %s439_s16 = scalar_lea.vmem %s621_s29, 128  ;;  %s538_s17 = smov [#allocation2]  }
  0x23   : > { %p440_p3 = scmp.ne.s32.totalorder %s621_s29, %s439_s16  ;;  %s444_s22 = sshll.u32 %s538_s17, 4  ;;  %s445_s22 = int_to_ptr.vmem [resolvable:$false] %s444_s22 }
  0x24   : > { %s446_s23 = scalar_lea.vmem %s445_s22, 256  ;;  %p447_p9 = scmp.lt.s32.totalorder %s621_s29, %s445_s22 }
  0x25   : > { %p442_p6 = pnand %p440_p3, %p426_p5  ;;  %p448_p4 = scmp.lt.s32.totalorder %s446_s23, %s439_s16 }
  0x27   : > { %p443_p11 = pneg %p442_p6  ;;  %p449_p10 = por %p448_p4, %p447_p9 }
  0x29   : > { %p450_p12 = pnand %p449_p10, %p443_p11 }
  0x2b   : > { %453 = shalt.err (!%p450_p12)
}
  0x2c   : > { %361 = dma.hbm_to_vmem [thread:$0]  (!%p625_p0), %s619_s27, 128, %s621_s29, %s102_s2  }
  0x2d   : > { %p738_p1 = scmp.lt.s32.totalorder %s536_s11, 3  ;;  %p739_p2 = scmp.ge.s32.totalorder %s536_s11, 1 }
  0x2f   : > { %p121_p5 = pnand %p739_p2, %p738_p1 }
  0x30   : > { %s661_s24 = sand.u32 (!%p121_p5), 1, %s520_s7  }
  0x31   : > { %124 = sbr.rel (%p121_p5) target bundleno = 346 (0x15a), region = 24  ;;  %s344_s25 = sshll.u32 (!%p121_p5), %s661_s24, 3 }
  0x32   : > { %s127_s26 = scalar_lea.sflag (!%p121_p5), [#allocation3], %s661_s24  ;;  %s130_s28 = scalar_lea.vmem (!%p121_p5), [#allocation2], %s344_s25 }
  0x38   : > { %507 = dma.done.wait (%p597_p8), %s127_s26, 128  }
  0x39   : > { %509 = vsyncadd (%p597_p8), %s127_s26, 4294967168  ;;  %vm159_vm0 = vcmask 1043456   ;;  %v155_v0 = vld [vmem:[%s130_s28] sm:$0xff]  ;;  %v215_v35 = vlaneseq  ;;  %vm225_vm1 = vcmask 1040384   ;;  %s348_s18 = sshll.u32 %s528_s9, 7  ;;  %s148_s27 = scalar_lea.vmem [#allocation5], %s344_s25 }
  0x3a   : > { %v157_v1 = vcombine.high %v155_v0, %v155_v0  ;;  %v160_v2 = vsel %vm159_vm0, %v155_v0, -inf  ;;  %s255_s29 = sshll.u32 %s148_s27, 4  ;;  %s681_s4 = scalar_lea.hbm %s731_s1, %s348_s18  ;;  %s683_s29 = int_to_ptr.vmem [resolvable:$true] %s255_s29 }
  0x3b   : > { %v161_v3 = vrot.slane %v160_v2, 4  ;;  %v216_v39 = vshrl.u32 %v215_v35, 7  ;;  %s242_s5 = scalar_lea.sflag [#allocation4], %s661_s24  ;;  %s454_s12 = scalar_lea.vmem %s683_s29, 128 }
  0x3c   : > { %v167_v4 = vsel %vm159_vm0, %v157_v1, -inf  ;;  %p455_p8 = scmp.ne.s32.totalorder %s683_s29, %s454_s12  ;;  %p740_p9 = scmp.ne.s32.totalorder %s735_s19, 0 }
  0x3d   : > { %v162_v5 = vmax.f32 %v160_v2, %v161_v3  ;;  %v168_v6 = vrot.slane %v167_v4, 4  ;;  %v217_v44 = vsub.s32 0, %v216_v39  ;;  %v221_v45 = vsub.s32 4, %v216_v39  ;;  %s539_s9 = smov [#allocation5]  }
  0x3e   : > { %p456_p11 = pnand %p455_p8, %p740_p9  ;;  %s458_s13 = sshll.u32 %s539_s9, 4  ;;  %s459_s13 = int_to_ptr.vmem [resolvable:$false] %s458_s13 }
  0x3f   : > { %v163_v7 = vrot.slane %v162_v5, 2  ;;  %v169_v8 = vmax.f32 %v167_v4, %v168_v6  ;;  %s460_s15 = scalar_lea.vmem %s459_s13, 256  ;;  %p461_p7 = scmp.lt.s32.totalorder %s683_s29, %s459_s13 }
  0x40   : > { %p457_p0 = pneg %p456_p11  ;;  %p462_p13 = scmp.lt.s32.totalorder %s460_s15, %s454_s12 }
  0x41   : > { %v164_v9 = vmax.f32 %v162_v5, %v163_v7  ;;  %v170_v10 = vrot.slane %v169_v8, 2 }
  0x42   : > { %p463_p3 = por %p462_p13, %p461_p7 }
  0x43   : > { %v165_v11 = vrot.slane %v164_v9, 1  ;;  %v171_v12 = vmax.f32 %v169_v8, %v170_v10 }
  0x44   : > { %p464_p6 = pnand %p463_p3, %p457_p0 }
  0x45   : > { %v166_v13 = vmax.f32 %v164_v9, %v165_v11  ;;  %v172_v14 = vrot.slane %v171_v12, 1 }
  0x47   : > { %v173_v15 = vmax.f32 %v171_v12, %v172_v14 }
  0x49   : > { %v176_v16 = vcombine.low %v166_v13, %v173_v15 }
  0x4b   : > { %v178_v17 = vsub.f32 %v155_v0, %v176_v16 }
  0x4d   : > { %v179_v18 = vmul.f32 1.442695, %v178_v17 }
  0x4f   : > { %418 = vpow2.f32 %v179_v18 }
  0x59   : > { %v419_v19 = vpop.eup %418 }
  0x5a   : > { %v182_v20 = vcombine.high %v419_v19, %v419_v19  ;;  %v184_v21 = vsel %vm159_vm0, %v419_v19, 0.0  ;;  %v346_v36 = vrot.slane %v419_v19, 9 }
  0x5b   : > { %v185_v22 = vrot.slane %v184_v21, 4 }
  0x5c   : > { %v191_v23 = vsel %vm159_vm0, %v182_v20, 0.0  ;;  %v205_v41 = vmul.f32 %v419_v19, %v346_v36 }
  0x5d   : > { %v186_v24 = vadd.f32 %v185_v22, %v184_v21  ;;  %v192_v25 = vrot.slane %v191_v23, 4 }
  0x5f   : > { %v187_v26 = vrot.slane %v186_v24, 2  ;;  %v193_v27 = vadd.f32 %v192_v25, %v191_v23 }
  0x61   : > { %v188_v28 = vadd.f32 %v187_v26, %v186_v24  ;;  %v194_v29 = vrot.slane %v193_v27, 2 }
  0x63   : > { %v189_v30 = vrot.slane %v188_v28, 1  ;;  %v195_v31 = vadd.f32 %v194_v29, %v193_v27 }
  0x65   : > { %v190_v32 = vadd.f32 %v189_v30, %v188_v28  ;;  %v196_v33 = vrot.slane %v195_v31, 1 }
  0x67   : > { %v197_v34 = vadd.f32 %v196_v33, %v195_v31  ;;  %420 = vrcp.f32 %v190_v32 }
  0x69   : > { %422 = vrcp.f32 %v197_v34 }
  0x71   : > { %v421_v37 = vpop.eup %420 }
  0x72   : > { %v206_v38 = vmul.f32 %v421_v37, %v421_v37 }
  0x73   : > { %v423_v40 = vpop.eup %422 }
  0x74   : > { %v207_v42 = vmul.f32 %v423_v40, %v423_v40 }
  0x76   : > { %v210_v43 = vcombine.low %v206_v38, %v207_v42 }
  0x78   : > { %v212_v46 = vmul.f32 %v210_v43, %v205_v41 }
  0x7a   : > { %v218_v47 = vrot.slane %v212_v46, %v217_v44  ;;  %v222_v48 = vrot.slane %v212_v46, %v221_v45 }
  0x7c   : > { %v226_v49 = vsel %vm225_vm1, %v218_v47, 0.0  ;;  %v227_v50 = vsel %vm225_vm1, %v222_v48, 0.0 }
  0x7d   : > { %v228_v51 = vadd.f32 %v227_v50, %v226_v49 }
  0x7f   : > { %229 = vadd.xlane.f32.xlu0 %v228_v51 }
 0x10c   : > { %v230_v52 = vpop.xlane.xlu0 %229 }
 0x10d   : > { %v231_v53 = vrot.slane %v230_v52, 4 }
 0x10f   : > { %v232_v54 = vadd.f32 %v231_v53, %v230_v52 }
 0x111   : > { %v233_v55 = vrot.slane %v232_v54, 2 }
 0x113   : > { %v234_v56 = vadd.f32 %v233_v55, %v232_v54 }
 0x115   : > { %v235_v57 = vrot.slane %v234_v56, 1 }
 0x117   : > { %v236_v58 = vadd.f32 %v235_v57, %v234_v56 }
 0x119   : > { %352 = vpush %v236_v58 }
 0x14a   : > { %s353_s30 = spop %352 }
 0x14b   : > { %v238_v59 = vstv %s353_s30 }
 0x14c   : > { %240 = vst [vmem:[%s148_s27] sm:$0xff] %v238_v59 }
 0x14d   : > { %467 = shalt.err (!%p464_p6)
}
 0x14e   : > { %s468_s16 = scalar_lea.hbm %s681_s4, 128  ;;  %s472_s23 = scalar_lea.hbm %s731_s1, 256 }
 0x14f   : > { %p469_p4 = scmp.ne.s32.totalorder %s681_s4, %s468_s16  ;;  %p473_p1 = scmp.lt.u32.totalorder %s681_s4, %s731_s1 }
 0x150   : > { %p474_p2 = scmp.lt.u32.totalorder %s472_s23, %s468_s16  ;;  %p476_p8 = scmp.lt.u32.totalorder %s468_s16, %s681_s4 }
 0x151   : > { %p470_p10 = pnand %p469_p4, %p740_p9 }
 0x152   : > { %p475_p5 = por %p474_p2, %p473_p1 }
 0x153   : > { %p471_p12 = pneg %p470_p10 }
 0x154   : > { %p477_p11 = por %p476_p8, %p475_p5 }
 0x156   : > { %p478_p0 = pnand %p477_p11, %p471_p12 }
 0x158   : > { %481 = shalt.err (!%p478_p0)
}
 0x159   : > { %356 = dma.vmem_to_hbm [thread:$0]  (%p740_p9), %s683_s29, 128, %s681_s4, %s242_s5  }
 0x15a PF: > { %s267_s26 = sand.u32 1, %s516_s6   ;;  %p741_p7 = scmp.ne.s32.totalorder %s736_s21, 0 }
 0x15b   : > { %p742_p13 = scmp.ge.s32.totalorder %s536_s11, 2  ;;  %s268_s28 = scalar_lea.sflag [#allocation4], %s267_s26 }
 0x15d   : > { %p363_p3 = pnand %p742_p13, %p741_p7 }
 0x15f   : > { %511 = dma.done.wait (!%p363_p3), %s268_s28, 128  }
 0x160   : > { %513 = vsyncadd (!%p363_p3), %s268_s28, 4294967168  ;;  %s17_s11 = sadd.s32 1, %s536_s11   ;;  %s743_s6 = smov %s520_s7 }
 0x161   : > { %p14_p6 = scmp.ge.s32.totalorder %s17_s11, 4   ;;  %s744_s7 = smov %s524_s8 }
 0x162   : > { %s745_s8 = smov %s606_s20  ;;  %s746_s9 = smov %s532_s10 }
 0x163   : > { %s747_s10 = smov %s749_s14  ;;  %16 = sbr.rel (!%p14_p6) target bundleno = 6 (0x6), region = 73 }
 0x16a   :  { %273 = vsyncpa [#allocation3], 1 }
 0x16b   :  { %275 = vsyncpa [#allocation3 + $0x1], 1 }
 0x16c   :  { %276 = vsyncpa [#allocation4], 1 }
 0x16d   :  { %278 = vsyncpa [#allocation4 + $0x1], 1 }

</bundles_post_ra>
